<compile_context>
chip_gen: v5e
topology: v5e:2x2
jax: 0.10.0
libtpu: 0.0.40
codegen_flags: <defaults>
</compile_context>

<pallas_src>
import jax
import jax.numpy as jnp
from jax.experimental import pallas as pl
from jax.experimental.pallas import tpu as pltpu

HIDDEN = 64
H2 = 2 * HIDDEN          # fused hidden width (both nets side by side on lanes)
IN_PAD = 32              # concat(state, action) zero-padded to a sublane-aligned K
OUT_PAD = 8              # lane-packed output width (cols 0/1 used, rest zero)


def _double_q_kernel(x_ref, w1_ref, w2_ref, w3_ref, b_ref, o_ref):
    # x_ref: (TB, IN_PAD) bf16, w*: bf16, b_ref: (3, H2) f32, o_ref: (TB, OUT_PAD) f32
    x = x_ref[...]

    b1 = b_ref[0:1, :]                       # (1, H2) f32
    b2 = b_ref[1:2, :]                       # (1, H2) f32
    b3 = b_ref[2:3, 0:o_ref.shape[1]]        # (1, OUT_PAD) f32

    # Layer 1: fused [q1|q2] first linear + ReLU (f32 accumulate on the MXU).
    h = jnp.dot(x, w1_ref[...], preferred_element_type=jnp.float32) + b1
    h = jnp.maximum(h, 0.0).astype(jnp.bfloat16)

    # Layer 2: block-diagonal 128x128 linear + ReLU.
    h = jnp.dot(h, w2_ref[...], preferred_element_type=jnp.float32) + b2
    h = jnp.maximum(h, 0.0).astype(jnp.bfloat16)

    # Output layer: lane-packed (q1, q2, 0, ...) columns.
    q = jnp.dot(h, w3_ref[...], preferred_element_type=jnp.float32) + b3
    o_ref[...] = q


def double_q_forward(state, action, fused_params, block_b=1024):
    """state: (B, state_dim) f32, action: (B, action_dim) f32.
    fused_params = (w1f, w2f, w3f, bf) from fuse_double_q_params.
    Returns (q1, q2), each (B, 1) f32."""
    w1f, w2f, w3f, bf = fused_params
    B = state.shape[0]
    in_dim = state.shape[1] + action.shape[1]
    in_pad = w1f.shape[0]
    h2 = w2f.shape[0]
    out_pad = w3f.shape[1]

    # Pre-concatenate + zero-pad features, cast to bf16 (MXU-native operands).
    x = jnp.concatenate([state, action], axis=1).astype(jnp.bfloat16)
    x = jnp.pad(x, ((0, 0), (0, in_pad - in_dim)))

    # Batch blocking: small batches run as a single full-array block; large
    # batches are tiled (zero-padded up to a multiple of the block).
    if B <= block_b:
        tb, bp = B, B
    else:
        tb = block_b
        bp = -(-B // tb) * tb
        if bp != B:
            x = jnp.pad(x, ((0, bp - B), (0, 0)))
    grid = (bp // tb,)

    out = pl.pallas_call(
        _double_q_kernel,
        out_shape=jax.ShapeDtypeStruct((bp, out_pad), jnp.float32),
        grid_spec=pltpu.PrefetchScalarGridSpec(
            num_scalar_prefetch=0,
            grid=grid,
            in_specs=[
                pl.BlockSpec((tb, in_pad), lambda i: (i, 0)),       # activations: blocked over B
                pl.BlockSpec((in_pad, h2), lambda i: (0, 0)),       # weights: VMEM-resident
                pl.BlockSpec((h2, h2), lambda i: (0, 0)),
                pl.BlockSpec((h2, out_pad), lambda i: (0, 0)),
                pl.BlockSpec((bf.shape[0], h2), lambda i: (0, 0)),  # fused biases (single tile)
            ],
            out_specs=pl.BlockSpec((tb, out_pad), lambda i: (i, 0)),
        ),
        compiler_params=pltpu.CompilerParams(
            dimension_semantics=("parallel",),  # shards batch blocks across v7x TCs
        ),
    )(x, w1f, w2f, w3f, bf)

    q = out[:B]
    return q[:, 0:1], q[:, 1:2]


# ----------------------------- parameter building -----------------------------

def _orthogonal(key, out_dim, in_dim):
    """Matches torch.nn.init.orthogonal_ semantics (rows orthonormal if out<=in,
    columns orthonormal otherwise). Returns PyTorch layout (out_dim, in_dim) f32."""
    n, m = out_dim, in_dim
    a = jax.random.normal(key, (max(n, m), min(n, m)), dtype=jnp.float32)
    q, r = jnp.linalg.qr(a)
    d = jnp.diag(r)
    q = q * jnp.where(d >= 0.0, 1.0, -1.0)[None, :]   # sign fix (no zeroed columns)
    if n < m:
        q = q.T
    return q[:n, :m]


def make_q_params(key, state_dim, action_dim, hidden=HIDDEN):
    """One StateActionValueFunction's MLP: (w1, b1, w2, b2, w3, b3), weights (in, out)."""
    in_dim = state_dim + action_dim
    k1, k2, k3 = jax.random.split(key, 3)
    w1 = _orthogonal(k1, hidden, in_dim).T     # (in_dim, 64)
    w2 = _orthogonal(k2, hidden, hidden).T     # (64, 64)
    w3 = _orthogonal(k3, 1, hidden).T          # (64, 1)
    b1 = jnp.zeros((hidden,), jnp.float32)
    b2 = jnp.zeros((hidden,), jnp.float32)
    b3 = jnp.zeros((1,), jnp.float32)
    return (w1, b1, w2, b2, w3, b3)


def fuse_double_q_params(p1, p2, in_dim, hidden=HIDDEN, in_pad=IN_PAD, out_pad=OUT_PAD):
    """Fuses the twin Q-net parameters into 4 tile-aligned arrays (done once at init)."""
    w1_1, b1_1, w2_1, b2_1, w3_1, b3_1 = p1
    w1_2, b1_2, w2_2, b2_2, w3_2, b3_2 = p2
    h2 = 2 * hidden

    w1f = jnp.zeros((in_pad, h2), jnp.float32)
    w1f = w1f.at[:in_dim, :hidden].set(w1_1).at[:in_dim, hidden:].set(w1_2)

    w2f = jnp.zeros((h2, h2), jnp.float32)
    w2f = w2f.at[:hidden, :hidden].set(w2_1).at[hidden:, hidden:].set(w2_2)

    w3f = jnp.zeros((h2, out_pad), jnp.float32)
    w3f = w3f.at[:hidden, 0].set(w3_1[:, 0]).at[hidden:, 1].set(w3_2[:, 0])

    bf = jnp.zeros((3, h2), jnp.float32)
    bf = bf.at[0, :hidden].set(b1_1).at[0, hidden:].set(b1_2)
    bf = bf.at[1, :hidden].set(b2_1).at[1, hidden:].set(b2_2)
    bf = bf.at[2, 0].set(b3_1[0]).at[2, 1].set(b3_2[0])

    return (w1f.astype(jnp.bfloat16), w2f.astype(jnp.bfloat16),
            w3f.astype(jnp.bfloat16), bf)


def reference_forward(state, action, params):
    """Pure-JAX f32 reference of one Q-network (PyTorch-equivalent math)."""
    w1, b1, w2, b2, w3, b3 = params
    x = jnp.concatenate([state, action], axis=1)
    h = jax.nn.relu(x @ w1 + b1)
    h = jax.nn.relu(h @ w2 + b2)
    return h @ w3 + b3


if __name__ == "__main__":
    key = jax.random.PRNGKey(0)
    k_state, k_action, k_q1, k_q2 = jax.random.split(key, 4)

    batch = 2
    state_dim = 16   # input_dim_critic
    action_dim = 4   # action_dim

    state = jax.random.normal(k_state, (batch, state_dim), dtype=jnp.float32)
    action = jax.random.normal(k_action, (batch, action_dim), dtype=jnp.float32)

    params_q1 = make_q_params(k_q1, state_dim, action_dim)
    params_q2 = make_q_params(k_q2, state_dim, action_dim)
    fused = fuse_double_q_params(params_q1, params_q2, state_dim + action_dim)

    q1, q2 = double_q_forward(state, action, fused)
    q1 = jax.block_until_ready(q1)
    q2 = jax.block_until_ready(q2)

    # Sanity check against the pure-f32 reference (kernel uses bf16 MXU operands,
    # f32 accumulation -> relaxed tolerance).
    q1_ref = reference_forward(state, action, params_q1)
    q2_ref = reference_forward(state, action, params_q2)
    assert q1.shape == (batch, 1) and q2.shape == (batch, 1)
    assert jnp.allclose(q1, q1_ref, atol=5e-2, rtol=5e-2), "q1 mismatch"
    assert jnp.allclose(q2, q2_ref, atol=5e-2, rtol=5e-2), "q2 mismatch"

    print("KERNEL_OK")
</pallas_src>

<mosaic_0001>
module attributes {stable_mosaic.version = 11 : i64} {
  func.func @_double_q_kernel(%arg0: i32, %arg1: memref<2x32xbf16, #tpu.memory_space<vmem>>, %arg2: memref<32x128xbf16, #tpu.memory_space<vmem>>, %arg3: memref<128x128xbf16, #tpu.memory_space<vmem>>, %arg4: memref<128x8xbf16, #tpu.memory_space<vmem>>, %arg5: memref<3x128xf32, #tpu.memory_space<vmem>>, %arg6: memref<2x8xf32, #tpu.memory_space<vmem>>) attributes {dimension_semantics = [#tpu.dimension_semantics<parallel>], iteration_bounds = array<i64: 1>, scalar_prefetch = 0 : i64, scratch_operands = 0 : i64, tpu.core_type = #tpu.core_type<tc>, window_params = [{transform_indices = @transform_0, window_bounds = array<i64: 2, 32>}, {pipeline_mode = #tpu.pipeline_mode<synchronous>, transform_indices = @transform_1, window_bounds = array<i64: 32, 128>}, {pipeline_mode = #tpu.pipeline_mode<synchronous>, transform_indices = @transform_2, window_bounds = array<i64: 128, 128>}, {pipeline_mode = #tpu.pipeline_mode<synchronous>, transform_indices = @transform_3, window_bounds = array<i64: 128, 8>}, {pipeline_mode = #tpu.pipeline_mode<synchronous>, transform_indices = @transform_4, window_bounds = array<i64: 3, 128>}, {transform_indices = @transform_5, window_bounds = array<i64: 2, 8>}]} {
    %c0 = arith.constant 0 : index
    %c0_0 = arith.constant 0 : index
    %0 = vector.load %arg1[%c0, %c0_0] : memref<2x32xbf16, #tpu.memory_space<vmem>>, vector<2x32xbf16>
    %c0_1 = arith.constant 0 : index
    %c0_2 = arith.constant 0 : index
    %1 = vector.load %arg5[%c0_1, %c0_2] : memref<3x128xf32, #tpu.memory_space<vmem>>, vector<1x128xf32>
    %c1 = arith.constant 1 : index
    %c0_3 = arith.constant 0 : index
    %2 = vector.load %arg5[%c1, %c0_3] : memref<3x128xf32, #tpu.memory_space<vmem>>, vector<1x128xf32>
    %c2 = arith.constant 2 : index
    %c0_4 = arith.constant 0 : index
    %3 = vector.load %arg5[%c2, %c0_4] : memref<3x128xf32, #tpu.memory_space<vmem>>, vector<1x8xf32>
    %c0_5 = arith.constant 0 : index
    %c0_6 = arith.constant 0 : index
    %4 = vector.load %arg2[%c0_5, %c0_6] : memref<32x128xbf16, #tpu.memory_space<vmem>>, vector<32x128xbf16>
    %cst = arith.constant dense<0.000000e+00> : vector<2x128xf32>
    %5 = tpu.matmul %0, %4, %cst {dimension_numbers = #tpu.dot_dimension_numbers<[1], [0], [0], [1], [0, 0, 1, 1], [], []>} : vector<2x32xbf16>, vector<32x128xbf16>, vector<2x128xf32> -> vector<2x128xf32>
    %6 = vector.broadcast %1 : vector<1x128xf32> to vector<2x128xf32>
    %7 = arith.addf %5, %6 : vector<2x128xf32>
    %cst_7 = arith.constant 0.000000e+00 : f32
    %8 = vector.broadcast %cst_7 : f32 to vector<2x128xf32>
    %9 = arith.maximumf %7, %8 : vector<2x128xf32>
    %10 = arith.truncf %9 : vector<2x128xf32> to vector<2x128xbf16>
    %c0_8 = arith.constant 0 : index
    %c0_9 = arith.constant 0 : index
    %11 = vector.load %arg3[%c0_8, %c0_9] : memref<128x128xbf16, #tpu.memory_space<vmem>>, vector<128x128xbf16>
    %cst_10 = arith.constant dense<0.000000e+00> : vector<2x128xf32>
    %12 = tpu.matmul %10, %11, %cst_10 {dimension_numbers = #tpu.dot_dimension_numbers<[1], [0], [0], [1], [0, 0, 1, 1], [], []>} : vector<2x128xbf16>, vector<128x128xbf16>, vector<2x128xf32> -> vector<2x128xf32>
    %13 = vector.broadcast %2 : vector<1x128xf32> to vector<2x128xf32>
    %14 = arith.addf %12, %13 : vector<2x128xf32>
    %cst_11 = arith.constant 0.000000e+00 : f32
    %15 = vector.broadcast %cst_11 : f32 to vector<2x128xf32>
    %16 = arith.maximumf %14, %15 : vector<2x128xf32>
    %17 = arith.truncf %16 : vector<2x128xf32> to vector<2x128xbf16>
    %c0_12 = arith.constant 0 : index
    %c0_13 = arith.constant 0 : index
    %18 = vector.load %arg4[%c0_12, %c0_13] : memref<128x8xbf16, #tpu.memory_space<vmem>>, vector<128x8xbf16>
    %cst_14 = arith.constant dense<0.000000e+00> : vector<2x8xf32>
    %19 = tpu.matmul %17, %18, %cst_14 {dimension_numbers = #tpu.dot_dimension_numbers<[1], [0], [0], [1], [0, 0, 1, 1], [], []>} : vector<2x128xbf16>, vector<128x8xbf16>, vector<2x8xf32> -> vector<2x8xf32>
    %20 = vector.broadcast %3 : vector<1x8xf32> to vector<2x8xf32>
    %21 = arith.addf %19, %20 : vector<2x8xf32>
    %c0_15 = arith.constant 0 : index
    %c0_16 = arith.constant 0 : index
    %22 = vector.load %arg6[%c0_15, %c0_16] : memref<2x8xf32, #tpu.memory_space<vmem>>, vector<2x8xf32>
    tpu.vector_store %arg6[%c0_15, %c0_16], %21 {strides = array<i32>} : memref<2x8xf32, #tpu.memory_space<vmem>>, vector<2x8xf32>,
    return
  }
  func.func @transform_0(%arg0: i32) -> (i32, i32) {
    %c0_i32 = arith.constant 0 : i32
    %c0_i32_0 = arith.constant 0 : i32
    return %arg0, %c0_i32 : i32, i32
  }
  func.func @transform_1(%arg0: i32) -> (i32, i32) {
    %c0_i32 = arith.constant 0 : i32
    %c0_i32_0 = arith.constant 0 : i32
    %c0_i32_1 = arith.constant 0 : i32
    return %c0_i32, %c0_i32_0 : i32, i32
  }
  func.func @transform_2(%arg0: i32) -> (i32, i32) {
    %c0_i32 = arith.constant 0 : i32
    %c0_i32_0 = arith.constant 0 : i32
    %c0_i32_1 = arith.constant 0 : i32
    return %c0_i32, %c0_i32_0 : i32, i32
  }
  func.func @transform_3(%arg0: i32) -> (i32, i32) {
    %c0_i32 = arith.constant 0 : i32
    %c0_i32_0 = arith.constant 0 : i32
    %c0_i32_1 = arith.constant 0 : i32
    return %c0_i32, %c0_i32_0 : i32, i32
  }
  func.func @transform_4(%arg0: i32) -> (i32, i32) {
    %c0_i32 = arith.constant 0 : i32
    %c0_i32_0 = arith.constant 0 : i32
    %c0_i32_1 = arith.constant 0 : i32
    return %c0_i32, %c0_i32_0 : i32, i32
  }
  func.func @transform_5(%arg0: i32) -> (i32, i32) {
    %c0_i32 = arith.constant 0 : i32
    %c0_i32_0 = arith.constant 0 : i32
    return %arg0, %c0_i32 : i32, i32
  }
}

</mosaic_0001>

<bundles_post_ra>
// kernel: tpu_custom_call.1
= control target key start
LH: loop header
LB: loop body
LE: loop exit
PB: predicated region body
PF: predicated region fallthrough
CT: control target
= control target key end

     0   :  { %10 = vsyncpa [#allocation3], 0  ;;  %s505_s0 = inlined_call_operand.vmem [shape: bf16[2,32], index: 0, kind: input, shape index: {}]   ;;  %s506_s1 = inlined_call_operand.hbm [shape: bf16[32,128], index: 1, kind: input, shape index: {}]   ;;  %s507_s2 = inlined_call_operand.vmem [shape: bf16[128,128], index: 2, kind: input, shape index: {}]   ;;  %s508_s3 = inlined_call_operand.vmem [shape: bf16[128,8], index: 3, kind: input, shape index: {}]   ;;  %s509_s4 = inlined_call_operand.vmem [shape: f32[3,128], index: 4, kind: input, shape index: {}]   ;;  %s510_s5 = inlined_call_operand.hbm [shape: f32[2,8], index: 5, kind: output, shape index: {}]  }
   0x1   :  { %11 = vsyncpa [#allocation4], 0  ;;  %s18_s20 = sshll.u32 %s506_s1, 4  ;;  %s405_s21 = smov [#allocation2]   ;;  %s19_s20 = int_to_ptr.hbm [resolvable:$true] %s18_s20 }
   0x2   :  { %s20_s22 = sshll.u32 %s405_s21, 4  ;;  %s406_s23 = smov 64   ;;  %s21_s22 = int_to_ptr.vmem [resolvable:$true] %s20_s22 }
   0x3   :  { %s407_s24 = smov 4  }
   0x4   :  { %26 = dma.hbm_to_vmem [thread:$0]  %s19_s20, 256, %s21_s22, [#allocation3], %s406_s23, %s406_s23, %s407_s24  }
   0x5   :  { %401 = dma.done.wait [#allocation3], 256  }
   0x6   :  { %402 = vsyncadd [#allocation3], 4294967040  ;;  %v329_v0 = vld [vmem:[#allocation2 + $0x8] sm:$0xff]  ;;  %v337_v1 = vld [vmem:[%s507_s2 + $0x38] sm:$0xff]  ;;  %vm59_vm0 = vcmask 261120   ;;  %s408_s11 = smov [#allocation5]  }
   0x7   :  { %69 = vmatpush.bf16.msra.mxu0 %v329_v0  ;;  %v328_v2 = vld [vmem:[#allocation2] sm:$0xff]  ;;  %143 = vmatpush.bf16.msra.mxu1 %v337_v1  ;;  %v336_v3 = vld [vmem:[%s507_s2 + $0x30] sm:$0xff]  ;;  %v335_v5 = vld [vmem:[%s507_s2 + $0x28] sm:$0xff]  ;;  %vm236_vm1 = vcmask 58368  }
   0x8   :  { %v38_v4 = vld [vmem:[%s505_s0] sm:$0x1]  ;;  %v333_v7 = vld [vmem:[%s507_s2 + $0x18] sm:$0xff]  ;;  %v332_v8 = vld [vmem:[%s507_s2 + $0x10] sm:$0xff]  ;;  %s243_s0 = sshll.u32 %s408_s11, 4  ;;  %s244_s0 = int_to_ptr.vmem [resolvable:$true] %s243_s0 }
   0x9   :  { %v334_v6 = vld [vmem:[%s507_s2 + $0x20] sm:$0xff]  ;;  %v331_v9 = vld [vmem:[%s507_s2 + $0x8] sm:$0xff]  ;;  %v345_v11 = vld [vmem:[%s508_s3 + $0x38] sm:$0xff] }
   0xa   :  { %v330_v10 = vld [vmem:[%s507_s2] sm:$0xff]  ;;  %223 = vmatpush.bf16.msra.mxu2 %v345_v11  ;;  %v344_v12 = vld [vmem:[%s508_s3 + $0x30] sm:$0xff]  ;;  %v343_v13 = vld [vmem:[%s508_s3 + $0x28] sm:$0xff] }
   0xb   :  { %70 = vmatpush.bf16.msra.mxu0 %v328_v2  ;;  %144 = vmatpush.bf16.msra.mxu1 %v336_v3  ;;  %v342_v14 = vld [vmem:[%s508_s3 + $0x20] sm:$0xff]  ;;  %v341_v15 = vld [vmem:[%s508_s3 + $0x18] sm:$0xff]  ;;  %v340_v16 = vld [vmem:[%s508_s3 + $0x10] sm:$0xff] }
   0xc   :  { %v350_v17 = vld [vmem:[%s509_s4] ss:$0 sm:$0xff]  ;;  %v339_v23 = vld [vmem:[%s508_s3 + $0x8] sm:$0xff]  ;;  %v351_v25 = vld [vmem:[%s509_s4 + $0x1] ss:$0 sm:$0xff] }
   0xd   :  { %v338_v24 = vld [vmem:[%s508_s3] sm:$0xff]  ;;  %s245_s3 = sshll.u32 %s510_s5, 4  ;;  %s246_s3 = int_to_ptr.hbm [resolvable:$true] %s245_s3 }
   0xe   :  { %263 = vmatmul.msk.bf16.vlgmr.msra.gmra.mxu0 %vm59_vm0, %v38_v4  ;;  %224 = vmatpush.bf16.msra.mxu2 %v344_v12  ;;  %v352_v31 = vld [vmem:[%s509_s4 + $0x2] ss:$0 sm:$0xff] }
   0xf   :  { %145 = vmatpush.bf16.msra.mxu1 %v335_v5 }
  0x12   :  { %225 = vmatpush.bf16.msra.mxu2 %v343_v13 }
  0x13   :  { %146 = vmatpush.bf16.msra.mxu1 %v334_v6 }
  0x16   :  { %226 = vmatpush.bf16.msra.mxu2 %v342_v14 }
  0x17   :  { %147 = vmatpush.bf16.msra.mxu1 %v333_v7 }
  0x1a   :  { %227 = vmatpush.bf16.msra.mxu2 %v341_v15 }
  0x1b   :  { %148 = vmatpush.bf16.msra.mxu1 %v332_v8 }
  0x1e   :  { %228 = vmatpush.bf16.msra.mxu2 %v340_v16 }
  0x1f   :  { %149 = vmatpush.bf16.msra.mxu1 %v331_v9 }
  0x22   :  { %229 = vmatpush.bf16.msra.mxu2 %v339_v23 }
  0x23   :  { %150 = vmatpush.bf16.msra.mxu1 %v330_v10 }
  0x26   :  { %230 = vmatpush.bf16.msra.mxu2 %v338_v24 }
  0x8b   :  { %v72_v18 = vpop.f32.mrf.mxu0 }
  0x8c   :  { %v73_v19 = vadd.f32 %v350_v17, %v72_v18 }
  0x8e   :  { %v76_v20 = vmax.f32 %v73_v19, 0.0 }
  0x90   :  { %v77_v21 = vpack.c.bf16 %v76_v20, %v76_v20 }
  0x92   :  { %151 = vmatmul.bf16.vlgmr.msra.gmra.mxu1 %v77_v21 }
  0x93   :  { %v74_v22 = vpop.f32.mrf.mxu0 }
 0x10f   :  { %v152_v26 = vpop.f32.mrf.mxu1 }
 0x110   :  { %v153_v27 = vadd.f32 %v351_v25, %v152_v26 }
 0x112   :  { %v156_v28 = vmax.f32 %v153_v27, 0.0 }
 0x114   :  { %v157_v29 = vpack.c.bf16 %v156_v28, %v156_v28 }
 0x116   :  { %231 = vmatmul.bf16.vlgmr.msra.gmra.mxu2 %v157_v29 }
 0x117   :  { %v154_v30 = vpop.f32.mrf.mxu1 }
 0x199   :  { %v232_v32 = vpop.f32.mrf.mxu2 }
 0x19a   :  { %v233_v33 = vadd.f32 %v352_v31, %v232_v32 }
 0x19c   :  { %237 = vst.msk [vmem:[#allocation5] sm:$0x3] %vm236_vm1, %v233_v33 }
 0x19d   :  { %248 = dma.vmem_to_hbm [thread:$0]  %s244_s0, 32, %s246_s3, [#allocation4]  }
 0x1a1   :  { %v234_v34 = vpop.f32.mrf.mxu2 }
 0x1a2   :  { %403 = dma.done.wait [#allocation4], 32  }
 0x1a3   :  { %404 = vsyncadd [#allocation4], 4294967264 }
 0x1a4   :  { %253 = vsyncpa [#allocation3], 1 }
 0x1a5   :  { %254 = vsyncpa [#allocation4], 1 }

</bundles_post_ra>
